<compile_context>
chip_gen: v6e
topology: v6e:2x2x1
jax: 0.10.0
libtpu: 0.0.40
codegen_flags: <defaults>
</compile_context>

<pallas_src>
import jax
import jax.numpy as jnp
from jax.experimental import pallas as pl
from jax.experimental.pallas import tpu as pltpu


def _adv_head_fused_kernel(x_ref, w1_ref, b1_ref, w2_ref, b2_ref, o_ref):
    # x_ref:  (B, H1)
    # w1_ref: (H1, A*H2)   b1_ref: (1, A*H2)     -- heads folded into lanes
    # w2_ref: (A*H2, A*L)  b2_ref: (1, A*L)      -- block-diagonal layer 2
    # o_ref:  (B, A*L)
    h = jnp.dot(x_ref[...], w1_ref[...],
                preferred_element_type=jnp.float32) + b1_ref[...]
    h = jnp.tanh(h)                                # EUP
    y = jnp.dot(h.astype(w2_ref.dtype), w2_ref[...],
                preferred_element_type=jnp.float32) + b2_ref[...]
    o_ref[...] = y.astype(o_ref.dtype)


def adv_head_forward(x, w1, b1, w2, b2):
    """Runs all adversarial heads; returns stacked outputs (A, B, L).

    x:  (B, H1)
    w1: (A, H1, H2), b1: (A, 1, H2)
    w2: (A, H2, L),  b2: (A, 1, L)
    """
    A, H1, H2 = w1.shape
    _, _, L = w2.shape
    B = x.shape[0]

    # --- fold the head axis into the lane axis (layout prep, outside kernel) ---
    # Layer 1: columns [a*H2 : (a+1)*H2] of w1_f are head a's weight.
    w1_f = jnp.transpose(w1, (1, 0, 2)).reshape(H1, A * H2)
    b1_f = b1.reshape(1, A * H2)
    # Layer 2: block-diagonal (A*H2, A*L); block a maps head a's hidden to its
    # logits.  For small A the A x redundant zeros cost far less than per-head
    # grid steps would.
    w2_bd = jnp.einsum('ab,akl->akbl', jnp.eye(A, dtype=w2.dtype), w2)
    w2_bd = w2_bd.reshape(A * H2, A * L)
    b2_f = b2.reshape(1, A * L)

    vmem = pl.BlockSpec(memory_space=pltpu.MemorySpace.VMEM)
    flops = 2 * B * H1 * (A * H2) + 2 * B * (A * H2) * (A * L)
    bytes_accessed = 4 * (x.size + w1_f.size + b1_f.size
                          + w2_bd.size + b2_f.size + B * A * L)
    out2d = pl.pallas_call(
        _adv_head_fused_kernel,
        out_shape=jax.ShapeDtypeStruct((B, A * L), x.dtype),
        in_specs=[vmem, vmem, vmem, vmem, vmem],
        out_specs=vmem,
        cost_estimate=pl.CostEstimate(
            flops=flops,
            transcendentals=B * A * H2,
            bytes_accessed=bytes_accessed),
    )(x, w1_f, b1_f, w2_bd, b2_f)

    # (B, A*L) -> (A, B, L)
    return jnp.transpose(out2d.reshape(B, A, L), (1, 0, 2))


def adv_head_forward_reverse(x, w1, b1, w2, b2, lmbda=1.0):
    # ReverseLayerF is identity in the forward pass (gradient-reversal only).
    del lmbda
    return adv_head_forward(x, w1, b1, w2, b2)


def init_params(key, adv_count, h1, h2, num_labels, dtype=jnp.float32):
    """Deterministic per-head Linear params (PyTorch-style uniform init)."""
    ks = jax.random.split(key, 4)
    bound1 = 1.0 / (h1 ** 0.5)
    bound2 = 1.0 / (h2 ** 0.5)
    w1 = jax.random.uniform(ks[0], (adv_count, h1, h2), dtype, -bound1, bound1)
    b1 = jax.random.uniform(ks[1], (adv_count, 1, h2), dtype, -bound1, bound1)
    w2 = jax.random.uniform(ks[2], (adv_count, h2, num_labels), dtype, -bound2, bound2)
    b2 = jax.random.uniform(ks[3], (adv_count, 1, num_labels), dtype, -bound2, bound2)
    return w1, b1, w2, b2


if __name__ == "__main__":
    # Shapes consistent with the module:
    # AdvHead(adv_count=3, hid_sizes=[32, 32], num_labels=4, activation='tanh')
    ADV_COUNT, B, H1, H2, L = 3, 8, 32, 32, 4

    key = jax.random.PRNGKey(0)
    kx, kp = jax.random.split(key)
    x = jax.random.normal(kx, (B, H1), dtype=jnp.float32)
    w1, b1, w2, b2 = init_params(kp, ADV_COUNT, H1, H2, L)

    out = adv_head_forward(x, w1, b1, w2, b2)
    out = jax.block_until_ready(out)

    # Also exercise forward_reverse (identity in forward).
    out_rev = jax.block_until_ready(adv_head_forward_reverse(x, w1, b1, w2, b2))

    # Pure-JAX reference (list of per-head outputs, as in AdvHead.forward).
    ref = jnp.stack(
        [jnp.tanh(x @ w1[a] + b1[a]) @ w2[a] + b2[a] for a in range(ADV_COUNT)],
        axis=0,
    )
    assert out.shape == (ADV_COUNT, B, L)
    assert jnp.allclose(out, ref, atol=1e-5, rtol=1e-5), "mismatch vs reference"
    assert jnp.allclose(out_rev, ref, atol=1e-5, rtol=1e-5), "reverse mismatch"

    print("KERNEL_OK")
</pallas_src>

<mosaic_0001>
module attributes {stable_mosaic.version = 11 : i64} {
  func.func @_adv_head_fused_kernel(%arg0: memref<8x32xf32, #tpu.memory_space<vmem>>, %arg1: memref<32x96xf32, #tpu.memory_space<vmem>>, %arg2: memref<1x96xf32, #tpu.memory_space<vmem>>, %arg3: memref<96x12xf32, #tpu.memory_space<vmem>>, %arg4: memref<1x12xf32, #tpu.memory_space<vmem>>, %arg5: memref<8x12xf32, #tpu.memory_space<vmem>>) attributes {dimension_semantics = [], scalar_prefetch = 0 : i64, scratch_operands = 0 : i64, tpu.core_type = #tpu.core_type<tc>} {
    %c0 = arith.constant 0 : index
    %c0_0 = arith.constant 0 : index
    %0 = vector.load %arg0[%c0, %c0_0] : memref<8x32xf32, #tpu.memory_space<vmem>>, vector<8x32xf32>
    %c0_1 = arith.constant 0 : index
    %c0_2 = arith.constant 0 : index
    %1 = vector.load %arg1[%c0_1, %c0_2] : memref<32x96xf32, #tpu.memory_space<vmem>>, vector<32x96xf32>
    %cst = arith.constant dense<0.000000e+00> : vector<8x96xf32>
    %2 = tpu.matmul %0, %1, %cst {dimension_numbers = #tpu.dot_dimension_numbers<[1], [0], [0], [1], [0, 0, 1, 1], [], []>} : vector<8x32xf32>, vector<32x96xf32>, vector<8x96xf32> -> vector<8x96xf32>
    %c0_3 = arith.constant 0 : index
    %c0_4 = arith.constant 0 : index
    %3 = vector.load %arg2[%c0_3, %c0_4] : memref<1x96xf32, #tpu.memory_space<vmem>>, vector<1x96xf32>
    %4 = vector.broadcast %3 : vector<1x96xf32> to vector<8x96xf32>
    %5 = arith.addf %2, %4 : vector<8x96xf32>
    %6 = math.tanh %5 : vector<8x96xf32>
    %c0_5 = arith.constant 0 : index
    %c0_6 = arith.constant 0 : index
    %7 = vector.load %arg3[%c0_5, %c0_6] : memref<96x12xf32, #tpu.memory_space<vmem>>, vector<96x12xf32>
    %cst_7 = arith.constant dense<0.000000e+00> : vector<8x12xf32>
    %8 = tpu.matmul %6, %7, %cst_7 {dimension_numbers = #tpu.dot_dimension_numbers<[1], [0], [0], [1], [0, 0, 1, 1], [], []>} : vector<8x96xf32>, vector<96x12xf32>, vector<8x12xf32> -> vector<8x12xf32>
    %c0_8 = arith.constant 0 : index
    %c0_9 = arith.constant 0 : index
    %9 = vector.load %arg4[%c0_8, %c0_9] : memref<1x12xf32, #tpu.memory_space<vmem>>, vector<1x12xf32>
    %10 = vector.broadcast %9 : vector<1x12xf32> to vector<8x12xf32>
    %11 = arith.addf %8, %10 : vector<8x12xf32>
    %c0_10 = arith.constant 0 : index
    %c0_11 = arith.constant 0 : index
    %12 = vector.load %arg5[%c0_10, %c0_11] : memref<8x12xf32, #tpu.memory_space<vmem>>, vector<8x12xf32>
    tpu.vector_store %arg5[%c0_10, %c0_11], %11 {strides = array<i32>} : memref<8x12xf32, #tpu.memory_space<vmem>>, vector<8x12xf32>,
    return
  }
}

</mosaic_0001>

<bundles_post_ra>
// kernel: tpu_custom_call.1
= control target key start
LH: loop header
LB: loop body
LE: loop exit
PB: predicated region body
PF: predicated region fallthrough
CT: control target
= control target key end

     0   :  { %v304_v1 = vmov 0.0   ;;  %vm305_vm0 = vmmov 0   ;;  %s399_s0 = inlined_call_operand.vmem [shape: f32[8,32], index: 0, kind: input, shape index: {}]   ;;  %s400_s1 = inlined_call_operand.vmem [shape: f32[32,96], index: 1, kind: input, shape index: {}]   ;;  %s401_s2 = inlined_call_operand.vmem [shape: f32[1,96], index: 2, kind: input, shape index: {}]   ;;  %s402_s3 = inlined_call_operand.vmem [shape: f32[96,12], index: 3, kind: input, shape index: {}]   ;;  %s403_s4 = inlined_call_operand.vmem [shape: f32[1,12], index: 4, kind: input, shape index: {}]   ;;  %s404_s5 = inlined_call_operand.hbm [shape: f32[8,12], index: 5, kind: output, shape index: {}]  }
   0x1   :  { %v25_v0 = vld [vmem:[%s400_s1 + $0x18] sm:$0xff]  ;;  %239 = vmatprep.subr.mxu0 %v304_v1  ;;  %v24_v2 = vld [vmem:[%s400_s1 + $0x10] sm:$0xff]  ;;  %247 = vmatprep.mubr.msk.f32.mxu0 %vm305_vm0, %v304_v1  ;;  %v23_v5 = vld [vmem:[%s400_s1 + $0x8] sm:$0xff] }
   0x2   :  { %v119_v3 = vld [vmem:[%s402_s3 + $0x58] sm:$0xff]  ;;  %240 = vmatpush3.msra.mxu0 %v25_v0  ;;  %250 = vmatprep.subr.mxu1 %v304_v1  ;;  %v118_v4 = vld [vmem:[%s402_s3 + $0x50] sm:$0xff] }
   0x3   :  { %241 = vmatprep.subr.mxu0 %v304_v1  ;;  %251 = vmatpush3.msra.mxu1 %v119_v3 }
   0x4   :  { %10 = vsyncpa [#allocation3], 0  ;;  %242 = vmatpush3.msra.mxu0 %v24_v2  ;;  %252 = vmatprep.subr.mxu1 %v304_v1  ;;  %v117_v6 = vld [vmem:[%s402_s3 + $0x48] sm:$0xff]  ;;  %v22_v7 = vld [vmem:[%s400_s1] sm:$0xff]  ;;  %vm33_vm1 = vcmask 261120   ;;  %vm127_vm2 = vcmask 785408  }
   0x5   :  { %243 = vmatprep.subr.mxu0 %v304_v1  ;;  %253 = vmatpush3.msra.mxu1 %v118_v4  ;;  %v21_v8 = vld [vmem:[%s399_s0] sm:$0xff]  ;;  %v115_v10 = vld [vmem:[%s402_s3 + $0x38] sm:$0xff]  ;;  %v114_v11 = vld [vmem:[%s402_s3 + $0x30] sm:$0xff]  ;;  %s306_s29 = smov [#allocation2]   ;;  %vm201_vm3 = vcmask 97280  }
   0x6   :  { %244 = vmatpush3.msra.mxu0 %v23_v5  ;;  %254 = vmatprep.subr.mxu1 %v304_v1  ;;  %v116_v9 = vld [vmem:[%s402_s3 + $0x40] sm:$0xff]  ;;  %v113_v12 = vld [vmem:[%s402_s3 + $0x28] sm:$0xff]  ;;  %v111_v14 = vld [vmem:[%s402_s3 + $0x18] sm:$0xff] }
   0x7   :  { %245 = vmatprep.subr.mxu0 %v304_v1  ;;  %255 = vmatpush3.msra.mxu1 %v117_v6  ;;  %v112_v13 = vld [vmem:[%s402_s3 + $0x20] sm:$0xff]  ;;  %v110_v15 = vld [vmem:[%s402_s3 + $0x10] sm:$0xff]  ;;  %v109_v16 = vld [vmem:[%s402_s3 + $0x8] sm:$0xff] }
   0x8   :  { %246 = vmatpush3.msra.mxu0 %v22_v7  ;;  %256 = vmatprep.subr.mxu1 %v304_v1  ;;  %v108_v17 = vld [vmem:[%s402_s3] sm:$0xff]  ;;  %s209_s3 = sshll.u32 %s306_s29, 4  ;;  %s210_s3 = int_to_ptr.vmem [resolvable:$true] %s209_s3 }
   0x9   :  { %248 = vmatmul.mubr.msk.f32.vlgmr.msra.gmra.mxu0 %vm33_vm1, %v21_v8  ;;  %274 = vmatprep.mubr.msk.f32.mxu1 %vm305_vm0, %v304_v1  ;;  %v217_v18 = vld [vmem:[%s401_s2] ss:$0 sm:$0xff]  ;;  %s282_s2 = scalar_lea.vmem %s210_s3, 128  ;;  %p287_p1 = scmp.lt.s32.totalorder %s210_s3, %s210_s3 }
   0xa   :  { %257 = vmatpush3.msra.mxu1 %v116_v9  ;;  %v219_v23 = vld [vmem:[%s403_s4] ss:$0 sm:$0xff]  ;;  %p283_p0 = scmp.ne.s32.totalorder %s210_s3, %s282_s2  ;;  %p288_p2 = scmp.lt.s32.totalorder %s282_s2, %s282_s2 }
   0xb   :  { %258 = vmatprep.subr.mxu1 %v304_v1 }
   0xc   :  { %259 = vmatpush3.msra.mxu1 %v115_v10  ;;  %p289_p3 = por %p288_p2, %p287_p1 }
   0xd   :  { %260 = vmatprep.subr.mxu1 %v304_v1 }
   0xe   :  { %261 = vmatpush3.msra.mxu1 %v114_v11  ;;  %p290_p4 = pnand %p289_p3, %p283_p0 }
   0xf   :  { %262 = vmatprep.subr.mxu1 %v304_v1 }
  0x10   :  { %263 = vmatpush3.msra.mxu1 %v113_v12 }
  0x11   :  { %264 = vmatprep.subr.mxu1 %v304_v1 }
  0x12   :  { %265 = vmatpush3.msra.mxu1 %v112_v13 }
  0x13   :  { %266 = vmatprep.subr.mxu1 %v304_v1 }
  0x14   :  { %267 = vmatpush3.msra.mxu1 %v111_v14 }
  0x15   :  { %268 = vmatprep.subr.mxu1 %v304_v1 }
  0x16   :  { %269 = vmatpush3.msra.mxu1 %v110_v15 }
  0x17   :  { %270 = vmatprep.subr.mxu1 %v304_v1 }
  0x18   :  { %271 = vmatpush3.msra.mxu1 %v109_v16 }
  0x19   :  { %272 = vmatprep.subr.mxu1 %v304_v1 }
  0x1a   :  { %273 = vmatpush3.msra.mxu1 %v108_v17 }
  0xc9   :  { %v103_v19 = vpop.f32.mrf.mxu0 }
  0xca   :  { %v104_v20 = vadd.f32 %v217_v18, %v103_v19 }
  0xcb   :  { %v249_v21 = vpop.f32.mrf.mxu0 }
  0xcc   :  { %280 = vtanh.f32 %v104_v20 }
  0xd9   :  { %v281_v22 = vpop.eup %280 }
  0xda   :  { %275 = vmatmul.mubr.msk.f32.vlgmr.msra.gmra.mxu1 %vm127_vm2, %v281_v22 }
 0x19a   :  { %v197_v24 = vpop.f32.mrf.mxu1 }
 0x19b   :  { %v198_v25 = vadd.f32 %v219_v23, %v197_v24 }
 0x19c   :  { %v276_v26 = vpop.f32.mrf.mxu1 }
 0x19d   :  { %202 = vst.msk [vmem:[#allocation2] sm:$0xff] %vm201_vm3, %v198_v25 }
 0x19e   :  { %293 = shalt.err (!%p290_p4)
}
 0x19f   :  { %212 = dma.vmem_to_hbm [thread:$0]  %s210_s3, 128, %s404_s5, [#allocation3]  }
 0x1a0   :  { %302 = dma.done.wait [#allocation3], 128  }
 0x1a1   :  { %303 = vsyncadd [#allocation3], 4294967168 }
 0x1a2   :  { %216 = vsyncpa [#allocation3], 1 }

</bundles_post_ra>
